<compile_context>
chip_gen: v6e
topology: v6e:2x2x1
jax: 0.10.0
libtpu: 0.0.40
codegen_flags: <defaults>
</compile_context>

<pallas_src>
import jax
import jax.numpy as jnp
from jax.experimental import pallas as pl
from jax.experimental.pallas import tpu as pltpu


# --------------------------------------------------------------------------- #
# Kernel: one grid step == one RL3Q.forward() step; weights stay VMEM-resident.
# --------------------------------------------------------------------------- #
def rl3q_kernel(x_ref, zg_ref, zm_ref, hx0_ref,
                w_ih_ref, b_ih_ref, w_hh_ref, b_hh_ref, w_mu_ref, b_mu_ref,
                out_ref, hx_out_ref, hx_scr):
    B = hx0_ref.shape[0]
    Hp3 = b_ih_ref.shape[1]            # 3 * Hp (gates at 128-lane-aligned offsets)
    Hp = Hp3 // 3
    Ap = b_mu_ref.shape[1]

    # hx is loop-carried in VMEM scratch across the T grid steps.
    @pl.when(pl.program_id(0) == 0)
    def _():
        hx_scr[...] = hx0_ref[...]

    x = x_ref[0].astype(jnp.float32)   # (B, S)
    zg = zg_ref[0]                     # (B, 3*Hp) f32 (padding lanes are zero)
    zm = zm_ref[0]                     # (B, Ap)   f32
    hx = hx_scr[...]                   # (B, Hp)   f32

    # ---- ProbabilisticGRUCell (Bayesian input->hidden, local reparam) ----
    # Fused mean/variance matmul: rows [x ; x*x], cols [W_ih_mu | exp(W_ih_lv)].
    x_rows = jnp.concatenate([x, x * x], axis=0).astype(jnp.bfloat16)      # (2B, S)
    gi_all = jnp.dot(x_rows, w_ih_ref[...],
                     preferred_element_type=jnp.float32)                   # (2B, 6*Hp)
    gi_mean = gi_all[:B, :Hp3] + b_ih_ref[...]
    gi_var = gi_all[B:, Hp3:]
    gi = gi_mean + jnp.sqrt(gi_var + 1e-8) * zg

    # Deterministic hidden->hidden mean path.
    gh = jnp.dot(hx.astype(jnp.bfloat16), w_hh_ref[...],
                 preferred_element_type=jnp.float32) + b_hh_ref[...]       # (B, 3*Hp)

    r = jax.nn.sigmoid(gi[:, 0 * Hp:1 * Hp] + gh[:, 0 * Hp:1 * Hp])
    z = jax.nn.sigmoid(gi[:, 1 * Hp:2 * Hp] + gh[:, 1 * Hp:2 * Hp])
    n = jnp.tanh(gi[:, 2 * Hp:3 * Hp] + r * gh[:, 2 * Hp:3 * Hp])
    hx_new = (1.0 - z) * n + z * hx      # PyTorch GRUCell update convention

    # ---- LinearGaussian head (Bayesian linear, local reparameterization) ----
    h_rows = jnp.concatenate([hx_new, hx_new * hx_new],
                             axis=0).astype(jnp.bfloat16)                  # (2B, Hp)
    o_all = jnp.dot(h_rows, w_mu_ref[...],
                    preferred_element_type=jnp.float32)                    # (2B, 2*Ap)
    o_mean = o_all[:B, :Ap] + b_mu_ref[...]
    o_var = o_all[B:, Ap:]
    out = o_mean + jnp.sqrt(o_var + 1e-8) * zm

    hx_scr[...] = hx_new
    out_ref[0] = out.astype(out_ref.dtype)
    hx_out_ref[...] = hx_new.astype(hx_out_ref.dtype)


# --------------------------------------------------------------------------- #
# Wrapper: padding / layout plumbing + the single pallas_call.
# --------------------------------------------------------------------------- #
def _round_up(x, m):
    return ((x + m - 1) // m) * m


def _pad_gates_last(w, H, Hp):
    """(..., 3H) -> (..., 3*Hp): each gate's H cols placed at a 128-aligned offset."""
    lead = w.shape[:-1]
    w3 = w.reshape(lead + (3, H))
    w3 = jnp.pad(w3, [(0, 0)] * len(lead) + [(0, 0), (0, Hp - H)])
    return w3.reshape(lead + (3 * Hp,))


def rl3q_rollout(params, xs, hx0, zetas):
    """Runs T RL3Q steps (each step == the PyTorch module forward) in one pallas_call."""
    zgs, zms = zetas
    T, B, S = xs.shape
    H = hx0.shape[1]
    A = params["w_mu_mu"].shape[1]
    Hp = _round_up(H, 128)
    Ap = _round_up(A, 128)

    # Precompute exp(log-variance) once per call; lay out lane-aligned / lane-dense.
    w_ih_mu_p = _pad_gates_last(params["w_ih_mu"], H, Hp)                   # (S, 3Hp)
    w_ih_var_p = _pad_gates_last(jnp.exp(params["w_ih_lv"]), H, Hp)         # (S, 3Hp)
    w_ih_cat = jnp.concatenate([w_ih_mu_p, w_ih_var_p], axis=1).astype(jnp.bfloat16)
    b_ih_p = _pad_gates_last(params["b_ih"], H, Hp)                         # (1, 3Hp)

    w_hh_p = jnp.pad(_pad_gates_last(params["w_hh_mu"], H, Hp),
                     ((0, Hp - H), (0, 0))).astype(jnp.bfloat16)            # (Hp, 3Hp)
    b_hh_p = _pad_gates_last(params["b_hh"], H, Hp)                         # (1, 3Hp)

    w_mu_mu_p = jnp.pad(params["w_mu_mu"], ((0, Hp - H), (0, Ap - A)))
    w_mu_var_p = jnp.pad(jnp.exp(params["w_mu_lv"]), ((0, Hp - H), (0, Ap - A)))
    w_mu_cat = jnp.concatenate([w_mu_mu_p, w_mu_var_p], axis=1).astype(jnp.bfloat16)
    b_mu_p = jnp.pad(params["b_mu"], ((0, 0), (0, Ap - A)))                 # (1, Ap)

    zgs_p = _pad_gates_last(zgs, H, Hp)                                     # (T, B, 3Hp)
    zms_p = jnp.pad(zms, ((0, 0), (0, 0), (0, Ap - A)))                     # (T, B, Ap)
    hx0_p = jnp.pad(hx0, ((0, 0), (0, Hp - H)))                             # (B, Hp)

    const2 = lambda t: (0, 0)        # weights / hx0 / final-hx: resident, no re-DMA
    step3 = lambda t: (t, 0, 0)      # per-step tensors: blocked along t

    outs_p, hx_p = pl.pallas_call(
        rl3q_kernel,
        out_shape=(jax.ShapeDtypeStruct((T, B, Ap), jnp.float32),
                   jax.ShapeDtypeStruct((B, Hp), jnp.float32)),
        grid_spec=pltpu.PrefetchScalarGridSpec(
            num_scalar_prefetch=0,
            grid=(T,),
            in_specs=[
                pl.BlockSpec((1, B, S), step3),         # x_t
                pl.BlockSpec((1, B, 3 * Hp), step3),    # zeta_gru_t
                pl.BlockSpec((1, B, Ap), step3),        # zeta_mu_t
                pl.BlockSpec((B, Hp), const2),          # hx0
                pl.BlockSpec((S, 6 * Hp), const2),      # [W_ih_mu | exp(W_ih_lv)]
                pl.BlockSpec((1, 3 * Hp), const2),      # b_ih
                pl.BlockSpec((Hp, 3 * Hp), const2),     # W_hh_mu
                pl.BlockSpec((1, 3 * Hp), const2),      # b_hh
                pl.BlockSpec((Hp, 2 * Ap), const2),     # [W_mu_mu | exp(W_mu_lv)]
                pl.BlockSpec((1, Ap), const2),          # b_mu
            ],
            out_specs=(pl.BlockSpec((1, B, Ap), step3),   # per-step outputs
                       pl.BlockSpec((B, Hp), const2)),    # final hx (resident)
            scratch_shapes=[pltpu.VMEM((B, Hp), jnp.float32)],
        ),
        compiler_params=pltpu.CompilerParams(
            dimension_semantics=("arbitrary",)),          # sequential carry over t
    )(xs, zgs_p, zms_p, hx0_p,
      w_ih_cat, b_ih_p, w_hh_p, b_hh_p, w_mu_cat, b_mu_p)

    return outs_p[:, :, :A], hx_p[:, :H]


def rl3q_forward(params, x, hx, zeta):
    """Single step, matching RL3Q.forward(input, hx, zeta) -> (out, hx')."""
    zg, zm = zeta
    outs, hx_new = rl3q_rollout(params, x[None], hx, (zg[None], zm[None]))
    return outs[0], hx_new


# --------------------------------------------------------------------------- #
# Pure-JAX reference (for correctness checking only).
# --------------------------------------------------------------------------- #
def rl3q_reference(params, xs, hx0, zetas):
    zgs, zms = zetas
    H = hx0.shape[1]
    w_ih_var = jnp.exp(params["w_ih_lv"])
    w_mu_var = jnp.exp(params["w_mu_lv"])

    def step(hx, inp):
        x, zg, zm = inp
        gi = (x @ params["w_ih_mu"] + params["b_ih"]
              + jnp.sqrt((x * x) @ w_ih_var + 1e-8) * zg)
        gh = hx @ params["w_hh_mu"] + params["b_hh"]
        r = jax.nn.sigmoid(gi[:, :H] + gh[:, :H])
        z = jax.nn.sigmoid(gi[:, H:2 * H] + gh[:, H:2 * H])
        n = jnp.tanh(gi[:, 2 * H:] + r * gh[:, 2 * H:])
        hx_new = (1.0 - z) * n + z * hx
        out = (hx_new @ params["w_mu_mu"] + params["b_mu"]
               + jnp.sqrt((hx_new * hx_new) @ w_mu_var + 1e-8) * zm)
        return hx_new, out

    hx_T, outs = jax.lax.scan(step, hx0, (xs, zgs, zms))
    return outs, hx_T


def init_params(key, num_states, num_hidden, num_actions):
    ks = jax.random.split(key, 3)
    scale = 0.1
    return {
        # GRU input->hidden (mean + log-variance) and hidden->hidden
        "w_ih_mu": scale * jax.random.normal(ks[0], (num_states, 3 * num_hidden), jnp.float32),
        "w_ih_lv": jnp.full((num_states, 3 * num_hidden), -10.0, jnp.float32),
        "b_ih":    jnp.zeros((1, 3 * num_hidden), jnp.float32),
        "w_hh_mu": scale * jax.random.normal(ks[1], (num_hidden, 3 * num_hidden), jnp.float32),
        "w_hh_lv": jnp.full((num_hidden, 3 * num_hidden), -10.0, jnp.float32),
        "b_hh":    jnp.zeros((1, 3 * num_hidden), jnp.float32),
        # LinearGaussian head
        "w_mu_mu": scale * jax.random.normal(ks[2], (num_hidden, num_actions), jnp.float32),
        "w_mu_lv": jnp.full((num_hidden, num_actions), -10.0, jnp.float32),
        "b_mu":    jnp.zeros((1, num_actions), jnp.float32),
        # self.initial is 0.0 * randn(1, H) -> zeros; beta is unused in forward
        "initial": jnp.zeros((1, num_hidden), jnp.float32),
    }


if __name__ == "__main__":
    T, B = 8, 8
    num_states, num_hidden, num_actions = 8, 32, 4

    key = jax.random.PRNGKey(0)
    k_par, k_x, k_zg, k_zm = jax.random.split(key, 4)

    params = init_params(k_par, num_states, num_hidden, num_actions)

    xs = jax.random.normal(k_x, (T, B, num_states), jnp.float32)
    hx0 = jnp.broadcast_to(params["initial"], (B, num_hidden))          # initial_states(B)
    zetas = (jax.random.normal(k_zg, (T, B, 3 * num_hidden), jnp.float32),  # gru noise per step
             jax.random.normal(k_zm, (T, B, num_actions), jnp.float32))     # head noise per step

    # Fused multi-step rollout: one pallas_call for all T steps.
    outs, hx_T = jax.jit(rl3q_rollout)(params, xs, hx0, zetas)
    jax.block_until_ready((outs, hx_T))

    # Single-step call matching the PyTorch module's forward signature.
    out1, hx1 = jax.jit(rl3q_forward)(params, xs[0], hx0, (zetas[0][0], zetas[1][0]))
    jax.block_until_ready((out1, hx1))

    # Correctness / sanity checks.
    ref_outs, ref_hx = rl3q_reference(params, xs, hx0, zetas)
    assert outs.shape == (T, B, num_actions) and hx_T.shape == (B, num_hidden)
    assert out1.shape == (B, num_actions) and hx1.shape == (B, num_hidden)
    assert bool(jnp.all(jnp.isfinite(outs))) and bool(jnp.all(jnp.isfinite(hx_T)))
    assert bool(jnp.allclose(outs, ref_outs, atol=1e-1, rtol=1e-1))
    assert bool(jnp.allclose(hx_T, ref_hx, atol=1e-1, rtol=1e-1))
    assert bool(jnp.allclose(out1, outs[0], atol=1e-4, rtol=1e-4))
    print("KERNEL_OK")
</pallas_src>

<mosaic_0001>
module attributes {stable_mosaic.version = 11 : i64} {
  func.func @rl3q_kernel(%arg0: i32, %arg1: memref<1x8x8xf32, #tpu.memory_space<vmem>>, %arg2: memref<1x8x384xf32, #tpu.memory_space<vmem>>, %arg3: memref<1x8x128xf32, #tpu.memory_space<vmem>>, %arg4: memref<8x128xf32, #tpu.memory_space<vmem>>, %arg5: memref<8x768xbf16, #tpu.memory_space<vmem>>, %arg6: memref<1x384xf32, #tpu.memory_space<vmem>>, %arg7: memref<128x384xbf16, #tpu.memory_space<vmem>>, %arg8: memref<1x384xf32, #tpu.memory_space<vmem>>, %arg9: memref<128x256xbf16, #tpu.memory_space<vmem>>, %arg10: memref<1x128xf32, #tpu.memory_space<vmem>>, %arg11: memref<1x8x128xf32, #tpu.memory_space<vmem>>, %arg12: memref<8x128xf32, #tpu.memory_space<vmem>>, %arg13: memref<8x128xf32, #tpu.memory_space<vmem>>) attributes {dimension_semantics = [#tpu.dimension_semantics<arbitrary>], iteration_bounds = array<i64: 8>, scalar_prefetch = 0 : i64, scratch_operands = 1 : i64, tpu.core_type = #tpu.core_type<tc>, window_params = [{transform_indices = @transform_0, window_bounds = array<i64: 1, 8, 8>}, {transform_indices = @transform_1, window_bounds = array<i64: 1, 8, 384>}, {transform_indices = @transform_2, window_bounds = array<i64: 1, 8, 128>}, {pipeline_mode = #tpu.pipeline_mode<synchronous>, transform_indices = @transform_3, window_bounds = array<i64: 8, 128>}, {pipeline_mode = #tpu.pipeline_mode<synchronous>, transform_indices = @transform_4, window_bounds = array<i64: 8, 768>}, {pipeline_mode = #tpu.pipeline_mode<synchronous>, transform_indices = @transform_5, window_bounds = array<i64: 1, 384>}, {pipeline_mode = #tpu.pipeline_mode<synchronous>, transform_indices = @transform_6, window_bounds = array<i64: 128, 384>}, {pipeline_mode = #tpu.pipeline_mode<synchronous>, transform_indices = @transform_7, window_bounds = array<i64: 1, 384>}, {pipeline_mode = #tpu.pipeline_mode<synchronous>, transform_indices = @transform_8, window_bounds = array<i64: 128, 256>}, {pipeline_mode = #tpu.pipeline_mode<synchronous>, transform_indices = @transform_9, window_bounds = array<i64: 1, 128>}, {transform_indices = @transform_10, window_bounds = array<i64: 1, 8, 128>}, {pipeline_mode = #tpu.pipeline_mode<synchronous>, transform_indices = @transform_11, window_bounds = array<i64: 8, 128>}]} {
    %c0_i32 = arith.constant 0 : i32
    %0 = arith.cmpi eq, %arg0, %c0_i32 : i32
    %1 = arith.extui %0 : i1 to i32
    %c0_i32_0 = arith.constant 0 : i32
    %2 = arith.cmpi ne, %1, %c0_i32_0 : i32
    scf.if %2 {
      %c0_37 = arith.constant 0 : index
      %c0_38 = arith.constant 0 : index
      %77 = vector.load %arg4[%c0_37, %c0_38] : memref<8x128xf32, #tpu.memory_space<vmem>>, vector<8x128xf32>
      %c0_39 = arith.constant 0 : index
      %c0_40 = arith.constant 0 : index
      %78 = vector.load %arg13[%c0_39, %c0_40] : memref<8x128xf32, #tpu.memory_space<vmem>>, vector<8x128xf32>
      tpu.vector_store %arg13[%c0_39, %c0_40], %77 {strides = array<i32>} : memref<8x128xf32, #tpu.memory_space<vmem>>, vector<8x128xf32>,
    } else {
    }
    %c0 = arith.constant 0 : index
    %c0_1 = arith.constant 0 : index
    %c0_2 = arith.constant 0 : index
    %3 = vector.load %arg1[%c0, %c0_1, %c0_2] : memref<1x8x8xf32, #tpu.memory_space<vmem>>, vector<1x8x8xf32>
    %4 = vector.shape_cast %3 : vector<1x8x8xf32> to vector<8x8xf32>
    %c0_3 = arith.constant 0 : index
    %c0_4 = arith.constant 0 : index
    %c0_5 = arith.constant 0 : index
    %5 = vector.load %arg2[%c0_3, %c0_4, %c0_5] : memref<1x8x384xf32, #tpu.memory_space<vmem>>, vector<1x8x384xf32>
    %6 = vector.shape_cast %5 : vector<1x8x384xf32> to vector<8x384xf32>
    %c0_6 = arith.constant 0 : index
    %c0_7 = arith.constant 0 : index
    %c0_8 = arith.constant 0 : index
    %7 = vector.load %arg3[%c0_6, %c0_7, %c0_8] : memref<1x8x128xf32, #tpu.memory_space<vmem>>, vector<1x8x128xf32>
    %8 = vector.shape_cast %7 : vector<1x8x128xf32> to vector<8x128xf32>
    %c0_9 = arith.constant 0 : index
    %c0_10 = arith.constant 0 : index
    %9 = vector.load %arg13[%c0_9, %c0_10] : memref<8x128xf32, #tpu.memory_space<vmem>>, vector<8x128xf32>
    %10 = arith.mulf %4, %4 : vector<8x8xf32>
    %11 = tpu.concatenate %4, %10 in 0 : vector<8x8xf32>, vector<8x8xf32> -> vector<16x8xf32>
    %12 = arith.truncf %11 : vector<16x8xf32> to vector<16x8xbf16>
    %c0_11 = arith.constant 0 : index
    %c0_12 = arith.constant 0 : index
    %13 = vector.load %arg5[%c0_11, %c0_12] : memref<8x768xbf16, #tpu.memory_space<vmem>>, vector<8x768xbf16>
    %cst = arith.constant dense<0.000000e+00> : vector<16x768xf32>
    %14 = tpu.matmul %12, %13, %cst {dimension_numbers = #tpu.dot_dimension_numbers<[1], [0], [0], [1], [0, 0, 1, 1], [], []>} : vector<16x8xbf16>, vector<8x768xbf16>, vector<16x768xf32> -> vector<16x768xf32>
    %15 = vector.extract_strided_slice %14 {offsets = [0, 0], sizes = [8, 384], strides = [1, 1]} : vector<16x768xf32> to vector<8x384xf32>
    %c0_13 = arith.constant 0 : index
    %c0_14 = arith.constant 0 : index
    %16 = vector.load %arg6[%c0_13, %c0_14] : memref<1x384xf32, #tpu.memory_space<vmem>>, vector<1x384xf32>
    %17 = vector.broadcast %16 : vector<1x384xf32> to vector<8x384xf32>
    %18 = arith.addf %15, %17 : vector<8x384xf32>
    %19 = vector.extract_strided_slice %14 {offsets = [8, 384], sizes = [8, 384], strides = [1, 1]} : vector<16x768xf32> to vector<8x384xf32>
    %cst_15 = arith.constant 9.99999993E-9 : f32
    %20 = vector.broadcast %cst_15 : f32 to vector<8x384xf32>
    %21 = arith.addf %19, %20 : vector<8x384xf32>
    %22 = math.sqrt %21 : vector<8x384xf32>
    %23 = arith.mulf %22, %6 : vector<8x384xf32>
    %24 = arith.addf %18, %23 : vector<8x384xf32>
    %25 = arith.truncf %9 : vector<8x128xf32> to vector<8x128xbf16>
    %c0_16 = arith.constant 0 : index
    %c0_17 = arith.constant 0 : index
    %26 = vector.load %arg7[%c0_16, %c0_17] : memref<128x384xbf16, #tpu.memory_space<vmem>>, vector<128x384xbf16>
    %cst_18 = arith.constant dense<0.000000e+00> : vector<8x384xf32>
    %27 = tpu.matmul %25, %26, %cst_18 {dimension_numbers = #tpu.dot_dimension_numbers<[1], [0], [0], [1], [0, 0, 1, 1], [], []>} : vector<8x128xbf16>, vector<128x384xbf16>, vector<8x384xf32> -> vector<8x384xf32>
    %c0_19 = arith.constant 0 : index
    %c0_20 = arith.constant 0 : index
    %28 = vector.load %arg8[%c0_19, %c0_20] : memref<1x384xf32, #tpu.memory_space<vmem>>, vector<1x384xf32>
    %29 = vector.broadcast %28 : vector<1x384xf32> to vector<8x384xf32>
    %30 = arith.addf %27, %29 : vector<8x384xf32>
    %31 = vector.extract_strided_slice %24 {offsets = [0, 0], sizes = [8, 128], strides = [1, 1]} : vector<8x384xf32> to vector<8x128xf32>
    %32 = vector.extract_strided_slice %30 {offsets = [0, 0], sizes = [8, 128], strides = [1, 1]} : vector<8x384xf32> to vector<8x128xf32>
    %33 = arith.addf %31, %32 : vector<8x128xf32>
    %34 = arith.negf %33 : vector<8x128xf32>
    %35 = math.exp %34 : vector<8x128xf32>
    %cst_21 = arith.constant 1.000000e+00 : f32
    %36 = vector.broadcast %cst_21 : f32 to vector<8x128xf32>
    %37 = arith.addf %36, %35 : vector<8x128xf32>
    %38 = arith.divf %36, %37 : vector<8x128xf32>
    %39 = vector.extract_strided_slice %24 {offsets = [0, 128], sizes = [8, 128], strides = [1, 1]} : vector<8x384xf32> to vector<8x128xf32>
    %40 = vector.extract_strided_slice %30 {offsets = [0, 128], sizes = [8, 128], strides = [1, 1]} : vector<8x384xf32> to vector<8x128xf32>
    %41 = arith.addf %39, %40 : vector<8x128xf32>
    %42 = arith.negf %41 : vector<8x128xf32>
    %43 = math.exp %42 : vector<8x128xf32>
    %cst_22 = arith.constant 1.000000e+00 : f32
    %44 = vector.broadcast %cst_22 : f32 to vector<8x128xf32>
    %45 = arith.addf %44, %43 : vector<8x128xf32>
    %46 = arith.divf %44, %45 : vector<8x128xf32>
    %47 = vector.extract_strided_slice %24 {offsets = [0, 256], sizes = [8, 128], strides = [1, 1]} : vector<8x384xf32> to vector<8x128xf32>
    %48 = vector.extract_strided_slice %30 {offsets = [0, 256], sizes = [8, 128], strides = [1, 1]} : vector<8x384xf32> to vector<8x128xf32>
    %49 = arith.mulf %38, %48 : vector<8x128xf32>
    %50 = arith.addf %47, %49 : vector<8x128xf32>
    %51 = math.tanh %50 : vector<8x128xf32>
    %cst_23 = arith.constant 1.000000e+00 : f32
    %52 = vector.broadcast %cst_23 : f32 to vector<8x128xf32>
    %53 = arith.subf %52, %46 : vector<8x128xf32>
    %54 = arith.mulf %53, %51 : vector<8x128xf32>
    %55 = arith.mulf %46, %9 : vector<8x128xf32>
    %56 = arith.addf %54, %55 : vector<8x128xf32>
    %57 = arith.mulf %56, %56 : vector<8x128xf32>
    %58 = tpu.concatenate %56, %57 in 0 : vector<8x128xf32>, vector<8x128xf32> -> vector<16x128xf32>
    %59 = arith.truncf %58 : vector<16x128xf32> to vector<16x128xbf16>
    %c0_24 = arith.constant 0 : index
    %c0_25 = arith.constant 0 : index
    %60 = vector.load %arg9[%c0_24, %c0_25] : memref<128x256xbf16, #tpu.memory_space<vmem>>, vector<128x256xbf16>
    %cst_26 = arith.constant dense<0.000000e+00> : vector<16x256xf32>
    %61 = tpu.matmul %59, %60, %cst_26 {dimension_numbers = #tpu.dot_dimension_numbers<[1], [0], [0], [1], [0, 0, 1, 1], [], []>} : vector<16x128xbf16>, vector<128x256xbf16>, vector<16x256xf32> -> vector<16x256xf32>
    %62 = vector.extract_strided_slice %61 {offsets = [0, 0], sizes = [8, 128], strides = [1, 1]} : vector<16x256xf32> to vector<8x128xf32>
    %c0_27 = arith.constant 0 : index
    %c0_28 = arith.constant 0 : index
    %63 = vector.load %arg10[%c0_27, %c0_28] : memref<1x128xf32, #tpu.memory_space<vmem>>, vector<1x128xf32>
    %64 = vector.broadcast %63 : vector<1x128xf32> to vector<8x128xf32>
    %65 = arith.addf %62, %64 : vector<8x128xf32>
    %66 = vector.extract_strided_slice %61 {offsets = [8, 128], sizes = [8, 128], strides = [1, 1]} : vector<16x256xf32> to vector<8x128xf32>
    %cst_29 = arith.constant 9.99999993E-9 : f32
    %67 = vector.broadcast %cst_29 : f32 to vector<8x128xf32>
    %68 = arith.addf %66, %67 : vector<8x128xf32>
    %69 = math.sqrt %68 : vector<8x128xf32>
    %70 = arith.mulf %69, %8 : vector<8x128xf32>
    %71 = arith.addf %65, %70 : vector<8x128xf32>
    %c0_30 = arith.constant 0 : index
    %c0_31 = arith.constant 0 : index
    %72 = vector.load %arg13[%c0_30, %c0_31] : memref<8x128xf32, #tpu.memory_space<vmem>>, vector<8x128xf32>
    tpu.vector_store %arg13[%c0_30, %c0_31], %56 {strides = array<i32>} : memref<8x128xf32, #tpu.memory_space<vmem>>, vector<8x128xf32>,
    %c0_32 = arith.constant 0 : index
    %c0_33 = arith.constant 0 : index
    %c0_34 = arith.constant 0 : index
    %73 = vector.load %arg11[%c0_32, %c0_33, %c0_34] : memref<1x8x128xf32, #tpu.memory_space<vmem>>, vector<1x8x128xf32>
    %74 = vector.shape_cast %73 : vector<1x8x128xf32> to vector<8x128xf32>
    %75 = vector.shape_cast %71 : vector<8x128xf32> to vector<1x8x128xf32>
    tpu.vector_store %arg11[%c0_32, %c0_33, %c0_34], %75 {strides = array<i32>} : memref<1x8x128xf32, #tpu.memory_space<vmem>>, vector<1x8x128xf32>,
    %c0_35 = arith.constant 0 : index
    %c0_36 = arith.constant 0 : index
    %76 = vector.load %arg12[%c0_35, %c0_36] : memref<8x128xf32, #tpu.memory_space<vmem>>, vector<8x128xf32>
    tpu.vector_store %arg12[%c0_35, %c0_36], %56 {strides = array<i32>} : memref<8x128xf32, #tpu.memory_space<vmem>>, vector<8x128xf32>,
    return
  }
  func.func @transform_0(%arg0: i32) -> (i32, i32, i32) {
    %c0_i32 = arith.constant 0 : i32
    %c0_i32_0 = arith.constant 0 : i32
    %c0_i32_1 = arith.constant 0 : i32
    return %arg0, %c0_i32, %c0_i32_0 : i32, i32, i32
  }
  func.func @transform_1(%arg0: i32) -> (i32, i32, i32) {
    %c0_i32 = arith.constant 0 : i32
    %c0_i32_0 = arith.constant 0 : i32
    %c0_i32_1 = arith.constant 0 : i32
    return %arg0, %c0_i32, %c0_i32_0 : i32, i32, i32
  }
  func.func @transform_2(%arg0: i32) -> (i32, i32, i32) {
    %c0_i32 = arith.constant 0 : i32
    %c0_i32_0 = arith.constant 0 : i32
    %c0_i32_1 = arith.constant 0 : i32
    return %arg0, %c0_i32, %c0_i32_0 : i32, i32, i32
  }
  func.func @transform_3(%arg0: i32) -> (i32, i32) {
    %c0_i32 = arith.constant 0 : i32
    %c0_i32_0 = arith.constant 0 : i32
    %c0_i32_1 = arith.constant 0 : i32
    return %c0_i32, %c0_i32_0 : i32, i32
  }
  func.func @transform_4(%arg0: i32) -> (i32, i32) {
    %c0_i32 = arith.constant 0 : i32
    %c0_i32_0 = arith.constant 0 : i32
    %c0_i32_1 = arith.constant 0 : i32
    return %c0_i32, %c0_i32_0 : i32, i32
  }
  func.func @transform_5(%arg0: i32) -> (i32, i32) {
    %c0_i32 = arith.constant 0 : i32
    %c0_i32_0 = arith.constant 0 : i32
    %c0_i32_1 = arith.constant 0 : i32
    return %c0_i32, %c0_i32_0 : i32, i32
  }
  func.func @transform_6(%arg0: i32) -> (i32, i32) {
    %c0_i32 = arith.constant 0 : i32
    %c0_i32_0 = arith.constant 0 : i32
    %c0_i32_1 = arith.constant 0 : i32
    return %c0_i32, %c0_i32_0 : i32, i32
  }
  func.func @transform_7(%arg0: i32) -> (i32, i32) {
    %c0_i32 = arith.constant 0 : i32
    %c0_i32_0 = arith.constant 0 : i32
    %c0_i32_1 = arith.constant 0 : i32
    return %c0_i32, %c0_i32_0 : i32, i32
  }
  func.func @transform_8(%arg0: i32) -> (i32, i32) {
    %c0_i32 = arith.constant 0 : i32
    %c0_i32_0 = arith.constant 0 : i32
    %c0_i32_1 = arith.constant 0 : i32
    return %c0_i32, %c0_i32_0 : i32, i32
  }
  func.func @transform_9(%arg0: i32) -> (i32, i32) {
    %c0_i32 = arith.constant 0 : i32
    %c0_i32_0 = arith.constant 0 : i32
    %c0_i32_1 = arith.constant 0 : i32
    return %c0_i32, %c0_i32_0 : i32, i32
  }
  func.func @transform_10(%arg0: i32) -> (i32, i32, i32) {
    %c0_i32 = arith.constant 0 : i32
    %c0_i32_0 = arith.constant 0 : i32
    %c0_i32_1 = arith.constant 0 : i32
    return %arg0, %c0_i32, %c0_i32_0 : i32, i32, i32
  }
  func.func @transform_11(%arg0: i32) -> (i32, i32) {
    %c0_i32 = arith.constant 0 : i32
    %c0_i32_0 = arith.constant 0 : i32
    %c0_i32_1 = arith.constant 0 : i32
    return %c0_i32, %c0_i32_0 : i32, i32
  }
}

</mosaic_0001>

<bundles_post_ra>
// kernel: rl3q_rollout.1
= control target key start
LH: loop header
LB: loop body
LE: loop exit
PB: predicated region body
PF: predicated region fallthrough
CT: control target
= control target key end

     0   :  { %17 = vsyncpa [#allocation4], 0  ;;  %s1485_s17 = smov 0   ;;  %s1718_s0 = inlined_call_operand.vmem [shape: f32[8,8,8], index: 0, kind: input, shape index: {}]   ;;  %s1719_s1 = inlined_call_operand.vmem [shape: f32[8,8,384], index: 1, kind: input, shape index: {}]   ;;  %s1720_s2 = inlined_call_operand.vmem [shape: f32[8,8,128], index: 2, kind: input, shape index: {}]   ;;  %s1721_s3 = inlined_call_operand.vmem [shape: f32[8,128], index: 3, kind: input, shape index: {}]   ;;  %s1722_s4 = inlined_call_operand.vmem [shape: bf16[8,768], index: 4, kind: input, shape index: {}]   ;;  %s1723_s5 = inlined_call_operand.vmem [shape: f32[1,384], index: 5, kind: input, shape index: {}]   ;;  %s1724_s6 = inlined_call_operand.vmem [shape: bf16[128,384], index: 6, kind: input, shape index: {}]   ;;  %s1725_s7 = inlined_call_operand.vmem [shape: f32[1,384], index: 7, kind: input, shape index: {}]   ;;  %s1726_s8 = inlined_call_operand.vmem [shape: bf16[128,256], index: 8, kind: input, shape index: {}]   ;;  %s1727_s9 = inlined_call_operand.vmem [shape: f32[1,128], index: 9, kind: input, shape index: {}]   ;;  %s1728_s10 = inlined_call_operand.vmem [shape: f32[8,8,128], index: 10, kind: output, shape index: {0}]   ;;  %s1729_s11 = inlined_call_operand.hbm [shape: f32[8,128], index: 11, kind: output, shape index: {1}]  }
   0x1 LB: > { %s1491_s18 = sadd.s32 4294967295, %s1419_s17   ;;  %p1192_p0 = scmp.ge.s32.totalorder %s1419_s17, 1  ;;  %s1419_s17 = sphi %s1485_s17, %s23_s17  }
   0x2   : > { %p354_p1 = scmp.lt.s32.totalorder %s1419_s17, 9 }
   0x4   : > { %p355_p2 = pnand %p1192_p0, %p354_p1 }
   0x5   : > { %p401_p3 = scmp.lt.s32.totalorder (!%p355_p2), %s1491_s18, 7  ;;  %p1197_p4 = scmp.ne.s32.totalorder (!%p355_p2), %s1491_s18, 0 }
   0x6   : > { %358 = sbr.rel (%p355_p2) target bundleno = 543 (0x21f), region = 60 }
   0xb   : > { %s402_s19 = scalar_select %p401_p3, %s1491_s18, 7 }
   0xc   : > { %422 = sbr.rel (%p1197_p4) target bundleno = 19 (0x13), region = 64 }
   0xd   : > { %s1497_s20 = sshll.u32 %s402_s19, 3  ;;  %s1286_s21 = smul.u32 24, %s402_s19 }
   0xe   : > { %s404_s24 = scalar_lea.vmem %s1718_s0, %s1497_s20  ;;  %s413_s27 = scalar_lea.vmem %s1720_s2, %s1497_s20 }
   0xf   : > { %s1510_s30 = scalar_lea.vmem %s1719_s1, %s1286_s21  ;;  %s417_s14 = scalar_lea.vmem %s1728_s10, %s1497_s20 }
  0x11   : > { %v423_v0 = vld [vmem:[%s1721_s3] sm:$0xff] }
  0x12   : > { %424 = vst [vmem:[#allocation2] sm:$0xff] %v423_v0 }
  0x13 PF: > { %v433_v1 = vld [vmem:[%s1722_s4] sm:$0xff]  ;;  %vm455_vm0 = vcmask 1043456   ;;  %v1421_v4 = vmov 0   ;;  %v1307_v5 = vld [vmem:[%s1724_s6 + $0xac] ss:$12 sps:$4 sm:$0xff]   ;;  %vm451_vm1 = vcmask 64512  }
  0x14   : > { %v1199_v2 = vcombine.high %v433_v1, %v433_v1  ;;  %v1198_v3 = vcombine.low %v433_v1, %v433_v1  ;;  %506 = vmatprep.mubr.bf16.mxu0 %v1421_v4  ;;  %v425_v6 = vld [vmem:[%s404_s24] sm:$0xff]  ;;  %v434_v7 = vld [vmem:[%s1722_s4 + $0x8] sm:$0xff]  ;;  %857 = vmatprep.mubr.bf16.mxu1 %v1421_v4  ;;  %v1314_v15 = vld [vmem:[%s1724_s6 + $0x90] ss:$12 sps:$4 sm:$0xff]   ;;  %v1422_v29 = vmov 0.0   ;;  %vm1423_vm2 = vmmov 0  }
  0x15   : > { %v431_v8 = vmul.f32 %v425_v6, %v425_v6  ;;  %v1201_v9 = vcombine.high %v434_v7, %v434_v7  ;;  %v1310_v10 = vld [vmem:[%s1724_s6 + $0xa8] ss:$12 sps:$4 sm:$0xff]   ;;  %v1200_v11 = vcombine.low %v434_v7, %v434_v7  ;;  %825 = vmatprep.subr.bf16.mxu1 %v1307_v5  ;;  %v1317_v20 = vld [vmem:[%s1724_s6 + $0x78] ss:$12 sps:$4 sm:$0xff]   ;;  %v1321_v23 = vld [vmem:[%s1724_s6 + $0x60] ss:$12 sps:$4 sm:$0xff]   ;;  %v599_v7 = vlaneseq }
  0x16   : > { %1204 = vmatprep.subr.msk.bf16.mxu0 %vm455_vm0, %v1199_v2  ;;  %v457_v12 = vsel %vm455_vm0, %v1198_v3, 0  ;;  %v1312_v13 = vld [vmem:[%s1724_s6 + $0x94] ss:$12 sps:$4 sm:$0xff]   ;;  %826 = vmatpush1.bf16.msra.mxu1 %v1310_v10  ;;  %v1315_v17 = vld [vmem:[%s1724_s6 + $0x7c] ss:$12 sps:$4 sm:$0xff]   ;;  %p1291_p5 = scmp.eq.s32.totalorder %s1491_s18, 7 }
  0x17   : > { %489 = vmatpush1.bf16.msra.mxu0 %v457_v12  ;;  %v432_v14 = vpack.c.bf16 %v431_v8, %v425_v6  ;;  %v463_v16 = vsel %vm455_vm0, %v1200_v11, 0  ;;  %827 = vmatprep.subr.bf16.mxu1 %v1312_v13  ;;  %v435_v18 = vld [vmem:[%s1722_s4 + $0x10] sm:$0xff]  ;;  %v1323_v24 = vld [vmem:[%s1724_s6 + $0x4c] ss:$12 sps:$4 sm:$0xff]   ;;  %v1329_v30 = vld [vmem:[%s1724_s6 + $0x1c] ss:$12 sps:$4 sm:$0xff]  }
  0x18   : > { %1206 = vmatprep.subr.msk.bf16.mxu0 %vm455_vm0, %v1201_v9  ;;  %v1203_v19 = vcombine.high %v435_v18, %v435_v18  ;;  %v1318_v21 = vld [vmem:[%s1724_s6 + $0x64] ss:$12 sps:$4 sm:$0xff]   ;;  %v1202_v22 = vcombine.low %v435_v18, %v435_v18  ;;  %v1325_v26 = vld [vmem:[%s1724_s6 + $0x48] ss:$12 sps:$4 sm:$0xff]   ;;  %v1334_v35 = vld [vmem:[%s1724_s6] ss:$12 sps:$4 sm:$0xff]  }
  0x19   : > { %v1326_v27 = vld [vmem:[%s1724_s6 + $0x34] ss:$12 sps:$4 sm:$0xff]   ;;  %v1328_v28 = vld [vmem:[%s1724_s6 + $0x30] ss:$12 sps:$4 sm:$0xff]   ;;  %v1331_v32 = vld [vmem:[%s1724_s6 + $0x18] ss:$12 sps:$4 sm:$0xff]  }
  0x1a   : > { %1205 = vmatmul.mubr.msk.bf16.vlgmr.msra.gmra.mxu0 %vm451_vm1, %v432_v14  ;;  %828 = vmatpush1.bf16.msra.mxu1 %v1314_v15  ;;  %v469_v25 = vsel %vm455_vm0, %v1202_v22, 0  ;;  %v1335_v31 = vld [vmem:[%s1724_s6 + $0xb0] ss:$12 sps:$4 sm:$0xff]   ;;  %v1336_v33 = vld [vmem:[%s1724_s6 + $0x98] ss:$12 sps:$4 sm:$0xff]   ;;  %v1669_v10 = vshrl.u32 %v599_v7, 7 }
  0x1b   : > { %530 = vmatpush1.bf16.msra.mxu0 %v463_v16  ;;  %547 = vmatprep.mubr.bf16.mxu0 %v1421_v4  ;;  %v1332_v34 = vld [vmem:[%s1724_s6 + $0x4] ss:$12 sps:$4 sm:$0xff]   ;;  %v1337_v37 = vld [vmem:[%s1724_s6 + $0x80] ss:$12 sps:$4 sm:$0xff]   ;;  %v1338_v39 = vld [vmem:[%s1724_s6 + $0x68] ss:$12 sps:$4 sm:$0xff]  }
  0x1c   : > { %829 = vmatprep.subr.bf16.mxu1 %v1315_v17  ;;  %1208 = vmatprep.subr.msk.bf16.mxu0 %vm455_vm0, %v1203_v19  ;;  %v1596_v36 = vld [vmem:[#allocation2] sm:$0xff]  ;;  %v1339_v40 = vld [vmem:[%s1724_s6 + $0x50] ss:$12 sps:$4 sm:$0xff]   ;;  %v1342_v43 = vld [vmem:[%s1724_s6 + $0x8] ss:$12 sps:$4 sm:$0xff]   ;;  %v601_v11 = vsub.s32 0, %v1669_v10 }
  0x1d   : > { %v647_v38 = vpack.c.bf16 %v1596_v36, %v1596_v36  ;;  %v1340_v41 = vld [vmem:[%s1724_s6 + $0x38] ss:$12 sps:$4 sm:$0xff]   ;;  %v1341_v42 = vld [vmem:[%s1724_s6 + $0x20] ss:$12 sps:$4 sm:$0xff]   ;;  %v1345_v44 = vld [vmem:[%s1726_s8 + $0x74] ss:$8 sps:$4 sm:$0xff]  }
  0x1e   : > { %830 = vmatpush1.bf16.msra.mxu1 %v1317_v20  ;;  %v1343_v45 = vld [vmem:[%s1726_s8 + $0x70] ss:$8 sps:$4 sm:$0xff]   ;;  %v1348_v46 = vld [vmem:[%s1726_s8 + $0x64] ss:$8 sps:$4 sm:$0xff]   ;;  %v1346_v47 = vld [vmem:[%s1726_s8 + $0x60] ss:$8 sps:$4 sm:$0xff]  }
  0x1f   : > { %831 = vmatprep.subr.bf16.mxu1 %v1318_v21  ;;  %v1351_v48 = vld [vmem:[%s1726_s8 + $0x54] ss:$8 sps:$4 sm:$0xff]   ;;  %v1349_v49 = vld [vmem:[%s1726_s8 + $0x50] ss:$8 sps:$4 sm:$0xff]   ;;  %v1352_v50 = vld [vmem:[%s1726_s8 + $0x40] ss:$8 sps:$4 sm:$0xff]  }
  0x20   : > { %v1354_v51 = vld [vmem:[%s1726_s8 + $0x44] ss:$8 sps:$4 sm:$0xff]   ;;  %v1357_v52 = vld [vmem:[%s1726_s8 + $0x34] ss:$8 sps:$4 sm:$0xff]   ;;  %v1355_v53 = vld [vmem:[%s1726_s8 + $0x30] ss:$8 sps:$4 sm:$0xff]  }
  0x21   : > { %v1360_v54 = vld [vmem:[%s1726_s8 + $0x24] ss:$8 sps:$4 sm:$0xff]   ;;  %v1358_v55 = vld [vmem:[%s1726_s8 + $0x20] ss:$8 sps:$4 sm:$0xff]   ;;  %v1363_v56 = vld [vmem:[%s1726_s8 + $0x14] ss:$8 sps:$4 sm:$0xff]  }
  0x22   : > { %1207 = vmatmul.mubr.msk.bf16.vlgmr.msra.gmra.mxu0 %vm451_vm1, %v432_v14  ;;  %832 = vmatpush1.bf16.msra.mxu1 %v1321_v23  ;;  %v1361_v57 = vld [vmem:[%s1726_s8 + $0x10] ss:$8 sps:$4 sm:$0xff]   ;;  %v1366_v58 = vld [vmem:[%s1726_s8 + $0x4] ss:$8 sps:$4 sm:$0xff]   ;;  %v1364_v59 = vld [vmem:[%s1726_s8] ss:$8 sps:$4 sm:$0xff]  }
  0x23   : > { %571 = vmatpush1.bf16.msra.mxu0 %v469_v25  ;;  %588 = vmatprep.mubr.bf16.mxu0 %v1421_v4  ;;  %v1675_v12 = vld [vmem:[%s1723_s5] sm:$0x7]  ;;  %v605_v23 = vsub.s32 1, %v1669_v10 }
  0x24   : > { %833 = vmatprep.subr.bf16.mxu1 %v1323_v24  ;;  %1266 = vmatprep.subr.bf16.mxu0 %v1422_v29  ;;  %v680_v13 = vld [vmem:[%s1725_s7] sm:$0x7]  ;;  %v602_v17 = vrot.slane %v1675_v12, %v601_v11 }
  0x25   : > { %v685_v19 = vrot.slane %v680_v13, %v601_v11  ;;  %v426_v20 = vld [vmem:[%s1510_s30] sm:$0xff] }
  0x26   : > { %834 = vmatpush1.bf16.msra.mxu1 %v1325_v26 }
  0x27   : > { %835 = vmatprep.subr.bf16.mxu1 %v1326_v27 }
  0x2a   : > { %1209 = vmatmul.mubr.msk.bf16.vlgmr.msra.gmra.mxu0 %vm451_vm1, %v432_v14  ;;  %836 = vmatpush1.bf16.msra.mxu1 %v1328_v28 }
  0x2b   : > { %1267 = vmatpush3.bf16.msra.mxu0 %v1335_v31  ;;  %837 = vmatprep.subr.bf16.mxu1 %v1329_v30 }
  0x2c   : > { %1268 = vmatprep.subr.bf16.mxu0 %v1422_v29  ;;  %1282 = vmatprep.mubr.msk.bf16.mxu0 %vm1423_vm2, %v1422_v29 }
  0x2e   : > { %838 = vmatpush1.bf16.msra.mxu1 %v1331_v32  ;;  %v606_v32 = vrot.slane %v1675_v12, %v605_v23 }
  0x2f   : > { %1269 = vmatpush3.bf16.msra.mxu0 %v1336_v33  ;;  %839 = vmatprep.subr.bf16.mxu1 %v1332_v34 }
  0x30   : > { %1270 = vmatprep.subr.bf16.mxu0 %v1422_v29 }
  0x32   : > { %840 = vmatpush1.bf16.msra.mxu1 %v1334_v35 }
  0x33   : > { %1271 = vmatpush3.bf16.msra.mxu0 %v1337_v37  ;;  %1025 = vmatprep.subr.bf16.mxu1 %v1345_v44  ;;  %v427_v37 = vld [vmem:[%s1510_s30 + $0x8] sm:$0xff] }
  0x34   : > { %1272 = vmatprep.subr.bf16.mxu0 %v1422_v29 }
  0x35   : > { %858 = vmatmul.mubr.bf16.vlgmr.msra.gmra.mxu1 %v647_v38 }
  0x36   : > { %1057 = vmatprep.mubr.bf16.mxu1 %v1421_v4  ;;  %1026 = vmatpush1.bf16.msra.mxu1 %v1343_v45 }
  0x37   : > { %1273 = vmatpush3.bf16.msra.mxu0 %v1338_v39  ;;  %1027 = vmatprep.subr.bf16.mxu1 %v1348_v46 }
  0x38   : > { %1274 = vmatprep.subr.bf16.mxu0 %v1422_v29 }
  0x3a   : > { %1028 = vmatpush1.bf16.msra.mxu1 %v1346_v47 }
  0x3b   : > { %1275 = vmatpush3.bf16.msra.mxu0 %v1339_v40  ;;  %1029 = vmatprep.subr.bf16.mxu1 %v1351_v48 }
  0x3c   : > { %1276 = vmatprep.subr.bf16.mxu0 %v1422_v29 }
  0x3e   : > { %1030 = vmatpush1.bf16.msra.mxu1 %v1349_v49 }
  0x3f   : > { %1277 = vmatpush3.bf16.msra.mxu0 %v1340_v41  ;;  %1031 = vmatprep.subr.bf16.mxu1 %v1354_v51  ;;  %v689_v41 = vrot.slane %v680_v13, %v605_v23 }
  0x40   : > { %1278 = vmatprep.subr.bf16.mxu0 %v1422_v29 }
  0x42   : > { %1032 = vmatpush1.bf16.msra.mxu1 %v1352_v50 }
  0x43   : > { %1279 = vmatpush3.bf16.msra.mxu0 %v1341_v42  ;;  %1033 = vmatprep.subr.bf16.mxu1 %v1357_v52 }
  0x44   : > { %1280 = vmatprep.subr.bf16.mxu0 %v1422_v29 }
  0x46   : > { %1034 = vmatpush1.bf16.msra.mxu1 %v1355_v53 }
  0x47   : > { %1281 = vmatpush3.bf16.msra.mxu0 %v1342_v43  ;;  %1035 = vmatprep.subr.bf16.mxu1 %v1360_v54 }
  0x4a   : > { %1283 = vmatmul.mubr.bf16.vlgmr.msra.gmra.mxu0 %v647_v38  ;;  %1036 = vmatpush1.bf16.msra.mxu1 %v1358_v55 }
  0x4b   : > { %1037 = vmatprep.subr.bf16.mxu1 %v1363_v56 }
  0x4e   : > { %1038 = vmatpush1.bf16.msra.mxu1 %v1361_v57 }
  0x4f   : > { %1039 = vmatprep.subr.bf16.mxu1 %v1366_v58  ;;  %v609_v58 = vsub.s32 2, %v1669_v10 }
  0x52   : > { %1040 = vmatpush1.bf16.msra.mxu1 %v1364_v59 }
  0xda   : > { %v508_v60 = vpop.f32.mrf.mxu0 }
  0xdb   : > { %v614_v27 = vadd.f32 %v602_v17, %v508_v60 }
  0xdc   : > { %v510_v61 = vpop.f32.mrf.mxu0 }
  0xdd   : > { %v615_v43 = vadd.f32 %v606_v32, %v510_v61  ;;  %v693_v61 = vrot.slane %v680_v13, %v609_v58 }
  0xde   : > { %v512_v62 = vpop.f32.mrf.mxu0 }
  0xe0   : > { %v513_v63 = vpop.f32.mrf.mxu0 }
  0xe1   : > { %v428_v63 = vld [vmem:[%s1510_s30 + $0x10] sm:$0xff]  ;;  %s1424_s30 = smov [#allocation3]  }
  0xe2   : > { %v1667_v0 = vpop.f32.mrf.mxu0  ;;  %s1101_s16 = sshll.u32 %s1424_s30, 4  ;;  %s1102_s16 = int_to_ptr.vmem [resolvable:$true] %s1101_s16 }
  0xe3   : > { %s1385_s19 = scalar_lea.vmem %s1102_s16, 128  ;;  %p1392_p9 = scmp.lt.s32.totalorder %s1102_s16, %s1102_s16 }
  0xe4   : > { %v551_v1 = vpop.f32.mrf.mxu0  ;;  %p1386_p6 = scmp.ne.s32.totalorder %s1102_s16, %s1385_s19  ;;  %p1393_p10 = scmp.lt.s32.totalorder %s1385_s19, %s1385_s19 }
  0xe6   : > { %v552_v2 = vpop.f32.mrf.mxu0  ;;  %p1387_p7 = pnand %p1386_p6, %p1291_p5  ;;  %p1394_p11 = por %p1393_p10, %p1392_p9 }
  0xe7   : > { %v610_v2 = vrot.slane %v1675_v12, %v609_v58 }
  0xe8   : > { %v553_v3 = vpop.f32.mrf.mxu0  ;;  %p1388_p8 = pneg %p1387_p7 }
  0xe9   : > { %v617_v4 = vadd.f32 1e-08, %v553_v3 }
  0xea   : > { %v590_v5 = vpop.f32.mrf.mxu0  ;;  %p1395_p12 = pnand %p1394_p11, %p1388_p8 }
  0xeb   : > { %1367 = vrsqrt.f32 %v617_v4  ;;  %vm622_vm3 = vcmp.eq.f32.partialorder %v617_v4, inf  ;;  %v625_v21 = vand.u32 2147483648, %v617_v4  ;;  %vm624_vm4 = vcmp.eq.f32.partialorder %v617_v4, 0.0 }
  0xec   : > { %v591_v6 = vpop.f32.mrf.mxu0 }
  0xed   : > { %v616_v6 = vadd.f32 %v610_v2, %v1667_v0 }
  0xee   : > { %v592_v8 = vpop.f32.mrf.mxu0 }
  0xef   : > { %v618_v9 = vadd.f32 1e-08, %v592_v8 }
  0xf0   : > { %v594_v28 = vpop.f32.mrf.mxu0 }
  0xf1   : > { %1369 = vrsqrt.f32 %v618_v9  ;;  %v619_v35 = vadd.f32 1e-08, %v594_v28  ;;  %vm629_vm5 = vcmp.eq.f32.partialorder %v618_v9, inf  ;;  %v632_v38 = vand.u32 2147483648, %v618_v9 }
  0xf2   : > { %vm631_vm6 = vcmp.eq.f32.partialorder %v618_v9, 0.0 }
  0xf3   : > { %1371 = vrsqrt.f32 %v619_v35  ;;  %vm636_vm7 = vcmp.eq.f32.partialorder %v619_v35, inf  ;;  %v639_v60 = vand.u32 2147483648, %v619_v35  ;;  %vm638_vm8 = vcmp.eq.f32.partialorder %v619_v35, 0.0 }
  0xf5   : > { %v859_v14 = vpop.f32.mrf.mxu1 }
  0xf6   : > { %v860_v30 = vadd.f32 %v859_v14, %v685_v19 }
  0xf7   : > { %v861_v16 = vpop.f32.mrf.mxu1 }
  0xf8   : > { %v1368_v15 = vpop.eup %1367  ;;  %v862_v47 = vadd.f32 %v861_v16, %v689_v41 }
  0xf9   : > { %v621_v18 = vmul.f32 %v1368_v15, %v617_v4  ;;  %v863_v22 = vpop.f32.mrf.mxu1 }
  0xfb   : > { %v623_v24 = vsel %vm622_vm3, %v617_v4, %v621_v18  ;;  %v864_v26 = vpop.f32.mrf.mxu1 }
  0xfc   : > { %v626_v25 = vsel %vm624_vm4, %v625_v21, %v623_v24 }
  0xfd   : > { %v641_v29 = vmul.f32 %v626_v25, %v426_v20 }
  0xfe   : > { %v1370_v31 = vpop.eup %1369 }
  0xff   : > { %v644_v33 = vadd.f32 %v641_v29, %v614_v27  ;;  %v628_v34 = vmul.f32 %v1370_v31, %v618_v9 }
 0x100   : > { %v1372_v54 = vpop.eup %1371 }
 0x101   : > { %v906_v39 = vadd.f32 %v860_v30, %v644_v33  ;;  %v630_v40 = vsel %vm629_vm5, %v618_v9, %v628_v34  ;;  %v635_v57 = vmul.f32 %v1372_v54, %v619_v35 }
 0x102   : > { %v633_v42 = vsel %vm631_vm6, %v632_v38, %v630_v40 }
 0x103   : > { %v1234_v44 = vmul.f32 -1.442695, %v906_v39  ;;  %v642_v45 = vmul.f32 %v633_v42, %v427_v37  ;;  %v637_v59 = vsel %vm636_vm7, %v619_v35, %v635_v57 }
 0x104   : > { %v640_v1 = vsel %vm638_vm8, %v639_v60, %v637_v59 }
 0x105   : > { %1373 = vpow2.f32 %v1234_v44  ;;  %v645_v46 = vadd.f32 %v642_v45, %v615_v43  ;;  %v643_v4 = vmul.f32 %v640_v1, %v428_v63 }
 0x107   : > { %v913_v48 = vadd.f32 %v862_v47, %v645_v46  ;;  %v646_v8 = vadd.f32 %v643_v4, %v616_v6 }
 0x109   : > { %v1235_v50 = vmul.f32 -1.442695, %v913_v48 }
 0x10a   : > { %v900_v49 = vpop.f32.mrf.mxu0 }
 0x10b   : > { %1375 = vpow2.f32 %v1235_v50  ;;  %v901_v5 = vadd.f32 %v900_v49, %v693_v61 }
 0x10c   : > { %v1284_v51 = vpop.f32.mrf.mxu0 }
 0x10e   : > { %v903_v52 = vpop.f32.mrf.mxu0 }
 0x110   : > { %v1285_v53 = vpop.f32.mrf.mxu0 }
 0x112   : > { %v1374_v55 = vpop.eup %1373 }
 0x113   : > { %v910_v56 = vadd.f32 1.0, %v1374_v55 }
 0x115   : > { %1377 = vrcp.f32 %v910_v56 }
 0x118   : > { %v1376_v62 = vpop.eup %1375 }
 0x119   : > { %v917_v3 = vadd.f32 1.0, %v1376_v62 }
 0x11b   : > { %1379 = vrcp.f32 %v917_v3 }
 0x122   : > { %v1378_v7 = vpop.eup %1377 }
 0x123   : > { %v920_v9 = vmul.f32 %v1378_v7, %v901_v5 }
 0x125   : > { %v921_v10 = vadd.f32 %v920_v9, %v646_v8 }
 0x127   : > { %1381 = vtanh.f32 %v921_v10 }
 0x128   : > { %v1380_v11 = vpop.eup %1379 }
 0x129   : > { %v923_v14 = vsub.f32 1.0, %v1380_v11  ;;  %v925_v16 = vmul.f32 %v1380_v11, %v1596_v36 }
 0x134   : > { %v1382_v13 = vpop.eup %1381 }
 0x135   : > { %v924_v15 = vmul.f32 %v1382_v13, %v923_v14 }
 0x137   : > { %v926_v12 = vadd.f32 %v925_v16, %v924_v15 }
 0x139   : > { %v927_v17 = vmul.f32 %v926_v12, %v926_v12  ;;  %1084 = vst [vmem:[#allocation2] sm:$0xff] %v926_v12  ;;  %1086 = vst [vmem:[#allocation3] sm:$0xff] %v926_v12 }
 0x13b   : > { %v928_v18 = vpack.c.bf16 %v927_v17, %v926_v12 }
 0x13d   : > { %1058 = vmatmul.mubr.bf16.vlgmr.msra.gmra.mxu1 %v928_v18 }
 0x13e   : > { %1398 = shalt.err (!%p1395_p12)
}
 0x13f   : > { %1288 = dma.vmem_to_hbm [thread:$0]  (%p1291_p5), %s1102_s16, 128, %s1729_s11, [#allocation4]   ;;  %v1252_v24 = vld [vmem:[%s1727_s9] ss:$0 sm:$0xff] }
 0x140   : > { %v429_v25 = vld [vmem:[%s413_s27] sm:$0xff] }
 0x1fd   : > { %v1059_v36 = vpop.f32.mrf.mxu1 }
 0x1fe   : > { %v1073_v29 = vadd.f32 %v1252_v24, %v1059_v36 }
 0x1ff   : > { %v1061_v0 = vpop.f32.mrf.mxu1 }
 0x201   : > { %v1062_v19 = vpop.f32.mrf.mxu1 }
 0x203   : > { %v1063_v20 = vpop.f32.mrf.mxu1 }
 0x204   : > { %v1074_v21 = vadd.f32 1e-08, %v1063_v20 }
 0x206   : > { %1383 = vrsqrt.f32 %v1074_v21  ;;  %vm1077_vm9 = vcmp.eq.f32.partialorder %v1074_v21, inf  ;;  %v1080_v26 = vand.u32 2147483648, %v1074_v21  ;;  %vm1079_vm10 = vcmp.eq.f32.partialorder %v1074_v21, 0.0 }
 0x213   : > { %v1384_v22 = vpop.eup %1383 }
 0x214   : > { %v1076_v23 = vmul.f32 %v1384_v22, %v1074_v21 }
 0x216   : > { %v1078_v27 = vsel %vm1077_vm9, %v1074_v21, %v1076_v23 }
 0x217   : > { %v1081_v28 = vsel %vm1079_vm10, %v1080_v26, %v1078_v27 }
 0x218   : > { %v1082_v30 = vmul.f32 %v1081_v28, %v429_v25 }
 0x21a   : > { %v1083_v31 = vadd.f32 %v1082_v30, %v1073_v29 }
 0x21c   : > { %1085 = vst [vmem:[%s417_s14] sm:$0xff] %v1083_v31 }
 0x21d   : > { %1414 = dma.done.wait (%p1291_p5), [#allocation4], 128  }
 0x21e   : > { %1416 = vsyncadd (%p1291_p5), [#allocation4], 4294967168 }
 0x21f PF: > { %s23_s17 = sadd.s32 1, %s1419_s17  }
 0x220   : > { %p20_p13 = scmp.ge.s32.totalorder %s23_s17, 10  }
 0x222   :  { %22 = sbr.rel (!%p20_p13) target bundleno = 1 (0x1), region = 109 }
 0x227   :  { %1121 = vsyncpa [#allocation4], 1 }
 0x228   :  { %1123 = vsyncpa [#allocation4 + $0x1], 1 }

</bundles_post_ra>
